<compile_context>
chip_gen: v7x
topology: tpu7x:2x2x1
jax: 0.10.0
libtpu: 0.0.40
codegen_flags: <defaults>
</compile_context>

<pallas_src>
import functools

import jax
import jax.numpy as jnp
from jax.experimental import pallas as pl
from jax.experimental.pallas import tpu as pltpu

MARGIN = 1.0
EPS_PD = 1e-6  # torch.nn.PairwiseDistance default eps (added to the difference)


def _round_up(x, m):
    return ((x + m - 1) // m) * m


def _transe_loss_kernel(pv1_ref, pv2_ref, pv3_ref, nv1_ref, nv3_ref, out_ref,
                        *, batch, margin, inv_s):
    """Per-batch-tile TransE hinge partial sum.

    pv*_ref : (TB, D)     bf16  gathered positive head / relation / tail rows
    nv*_ref : (S, TB, D)  bf16  gathered negative head / tail rows
    out_ref : (1, 1, 1)   f32   partial sum of hinge terms for this tile
    """
    p1 = pv1_ref[...].astype(jnp.float32)
    p2 = pv2_ref[...].astype(jnp.float32)
    p3 = pv3_ref[...].astype(jnp.float32)

    # positive distance || h + r - t + eps ||_2 -> (TB, 1)
    pd = p1 + p2 - p3 + EPS_PD
    posdis = jnp.sqrt(jnp.sum(pd * pd, axis=-1, keepdims=True))

    # negative distances; the relation vector is shared with the positive triple
    n1 = nv1_ref[...].astype(jnp.float32)           # (S, TB, D)
    n3 = nv3_ref[...].astype(jnp.float32)
    nd = n1 + p2[None, :, :] - n3 + EPS_PD
    negdis = jnp.sqrt(jnp.sum(nd * nd, axis=-1, keepdims=True))  # (S, TB, 1)
    negmean = jnp.sum(negdis, axis=0) * inv_s                    # (TB, 1)

    # per-triplet hinge, as in F.relu(posdis - mean(negdis) + margin)
    hinge = jnp.maximum(posdis - negmean + margin, 0.0)          # (TB, 1)

    # mask rows that were only added to pad the batch up to the tile size
    tb = hinge.shape[0]
    row = jax.lax.broadcasted_iota(jnp.int32, (tb, 1), 0) + pl.program_id(0) * tb
    hinge = jnp.where(row < batch, hinge, 0.0)

    out_ref[...] = jnp.sum(hinge).reshape(1, 1, 1)


def transe_loss(pos_h, pos_r, pos_t, neg_h, neg_t, batch, *, margin=MARGIN,
                block_b=512):
    """pos_*: (B_pad, D) bf16; neg_*: (S, B_pad, D) bf16; returns scalar f32."""
    b_pad, d = pos_h.shape
    s = neg_h.shape[0]
    tb = min(block_b, b_pad)
    assert b_pad % tb == 0 and tb % 8 == 0
    num_tiles = b_pad // tb

    kernel = functools.partial(_transe_loss_kernel, batch=batch, margin=margin,
                               inv_s=1.0 / s)

    pos_spec = pl.BlockSpec((tb, d), lambda i: (i, 0))
    neg_spec = pl.BlockSpec((s, tb, d), lambda i: (0, i, 0))

    partial_sums = pl.pallas_call(
        kernel,
        out_shape=jax.ShapeDtypeStruct((num_tiles, 1, 1), jnp.float32),
        grid_spec=pltpu.PrefetchScalarGridSpec(
            num_scalar_prefetch=0,
            grid=(num_tiles,),
            in_specs=[pos_spec, pos_spec, pos_spec, neg_spec, neg_spec],
            out_specs=pl.BlockSpec((1, 1, 1), lambda i: (i, 0, 0)),
        ),
        compiler_params=pltpu.CompilerParams(
            dimension_semantics=("parallel",),   # batch tiles are independent
            vmem_limit_bytes=32 * 1024 * 1024,   # tiles are ~2.3 MiB double-buffered
        ),
    )(pos_h, pos_r, pos_t, neg_h, neg_t)

    # finalize: add per-tile partial sums and multiply by 1/B once
    return jnp.sum(partial_sums) * (1.0 / batch)


def transe_forward(entity_tbl, relation_tbl, triplets, neg, *, margin=MARGIN,
                   block_b=512):
    """TransENet.forward given pre-sampled negatives.

    entity_tbl   : (E, D) bf16 (already max_norm-renormalized)
    relation_tbl : (R, D) bf16
    triplets     : (B, 3) int32 [head, relation, tail]
    neg          : (B, S, 3) int32 (relation column untouched by the sampler)
    """
    b = triplets.shape[0]

    # tile the (padded) batch; pad the *indices* (cheap) rather than the vectors
    tb = min(block_b, _round_up(b, 16))
    b_pad = _round_up(b, tb)
    pad = b_pad - b
    trip_p = jnp.pad(triplets, ((0, pad), (0, 0)))        # padded rows -> idx 0 (masked in kernel)
    neg_p = jnp.pad(neg, ((0, pad), (0, 0), (0, 0)))

    # embedding gathers (plain-JAX glue)
    pos_h = entity_tbl[trip_p[:, 0]]                      # (B_pad, D)
    pos_r = relation_tbl[trip_p[:, 1]]                    # (B_pad, D)
    pos_t = entity_tbl[trip_p[:, 2]]                      # (B_pad, D)
    # negatives gathered directly into (S, B_pad, D) layout (dense tiled dims)
    neg_h = entity_tbl[jnp.transpose(neg_p[:, :, 0])]     # (S, B_pad, D)
    neg_t = entity_tbl[jnp.transpose(neg_p[:, :, 2])]     # (S, B_pad, D)
    # negative relation vectors == positive relation vectors -> not gathered

    return transe_loss(pos_h, pos_r, pos_t, neg_h, neg_t, b, margin=margin,
                       block_b=tb)


# ---------------- host-side glue (sampler + embedding tables) ----------------

def sample_negatives(key, triplets, entity_num, sample_num):
    """TripletSampler: corrupt head or tail with a random offset in [1, E)."""
    b = triplets.shape[0]
    k1, k2 = jax.random.split(key)
    r = (jax.random.uniform(k1, (b, sample_num)) > 0.5).astype(jnp.int32)
    offset = jax.random.randint(k2, (b, sample_num), 1, entity_num, dtype=jnp.int32)
    neg = jnp.tile(triplets[:, None, :], (1, sample_num, 1))
    neg = neg.at[:, :, 0].set((neg[:, :, 0] + r * offset) % entity_num)
    neg = neg.at[:, :, 2].set((neg[:, :, 2] + (1 - r) * offset) % entity_num)
    return neg


def xavier_normal(key, shape):
    fan_out, fan_in = shape  # torch: fan_in = dim 1, fan_out = dim 0 (2-D weight)
    std = (2.0 / (fan_in + fan_out)) ** 0.5
    return jax.random.normal(key, shape, dtype=jnp.float32) * std


if __name__ == "__main__":
    ENTITY_NUM, RELATION_NUM, EMB_DIM = 64, 8, 128
    BATCH, SAMPLE_NUM = 8, 3

    key = jax.random.PRNGKey(0)
    k_ent, k_rel, k_h, k_r, k_t, k_neg = jax.random.split(key, 6)

    entity_emb = xavier_normal(k_ent, (ENTITY_NUM, EMB_DIM))
    relation_emb = xavier_normal(k_rel, (RELATION_NUM, EMB_DIM))

    # nn.Embedding(entityNum, embDim, max_norm=1): looked-up rows renormalized to
    # L2 norm <= 1. Applied to the whole table once (equivalent for one forward).
    # Relation embedding has max_norm=None -> untouched.
    ent_norm = jnp.linalg.norm(entity_emb, axis=-1, keepdims=True)
    entity_emb = entity_emb * jnp.minimum(1.0, 1.0 / jnp.maximum(ent_norm, 1e-7))

    # store/stream the tables in bf16 (bandwidth-bound); kernel accumulates in f32
    entity_tbl = entity_emb.astype(jnp.bfloat16)
    relation_tbl = relation_emb.astype(jnp.bfloat16)

    # deterministic batch of triplets
    heads = jax.random.randint(k_h, (BATCH,), 0, ENTITY_NUM, dtype=jnp.int32)
    rels = jax.random.randint(k_r, (BATCH,), 0, RELATION_NUM, dtype=jnp.int32)
    tails = jax.random.randint(k_t, (BATCH,), 0, ENTITY_NUM, dtype=jnp.int32)
    triplets = jnp.stack([heads, rels, tails], axis=-1)            # (B, 3)

    neg = sample_negatives(k_neg, triplets, ENTITY_NUM, SAMPLE_NUM)  # (B, S, 3)

    loss = transe_forward(entity_tbl, relation_tbl, triplets, neg)
    jax.block_until_ready(loss)
    print("KERNEL_OK")
</pallas_src>

<mosaic_0001>
module attributes {stable_mosaic.version = 11 : i64} {
  func.func @_transe_loss_kernel(%arg0: i32, %arg1: memref<16x128xbf16, #tpu.memory_space<vmem>>, %arg2: memref<16x128xbf16, #tpu.memory_space<vmem>>, %arg3: memref<16x128xbf16, #tpu.memory_space<vmem>>, %arg4: memref<3x16x128xbf16, #tpu.memory_space<vmem>>, %arg5: memref<3x16x128xbf16, #tpu.memory_space<vmem>>, %arg6: memref<1x1x1xf32, #tpu.memory_space<vmem>>) attributes {dimension_semantics = [#tpu.dimension_semantics<parallel>], iteration_bounds = array<i64: 1>, scalar_prefetch = 0 : i64, scratch_operands = 0 : i64, tpu.core_type = #tpu.core_type<tc>, window_params = [{transform_indices = @transform_0, window_bounds = array<i64: 16, 128>}, {transform_indices = @transform_1, window_bounds = array<i64: 16, 128>}, {transform_indices = @transform_2, window_bounds = array<i64: 16, 128>}, {transform_indices = @transform_3, window_bounds = array<i64: 3, 16, 128>}, {transform_indices = @transform_4, window_bounds = array<i64: 3, 16, 128>}, {transform_indices = @transform_5, window_bounds = array<i64: 1, 1, 1>}]} {
    %c0 = arith.constant 0 : index
    %c0_0 = arith.constant 0 : index
    %0 = vector.load %arg1[%c0, %c0_0] : memref<16x128xbf16, #tpu.memory_space<vmem>>, vector<16x128xbf16>
    %1 = arith.extf %0 : vector<16x128xbf16> to vector<16x128xf32>
    %c0_1 = arith.constant 0 : index
    %c0_2 = arith.constant 0 : index
    %2 = vector.load %arg2[%c0_1, %c0_2] : memref<16x128xbf16, #tpu.memory_space<vmem>>, vector<16x128xbf16>
    %3 = arith.extf %2 : vector<16x128xbf16> to vector<16x128xf32>
    %c0_3 = arith.constant 0 : index
    %c0_4 = arith.constant 0 : index
    %4 = vector.load %arg3[%c0_3, %c0_4] : memref<16x128xbf16, #tpu.memory_space<vmem>>, vector<16x128xbf16>
    %5 = arith.extf %4 : vector<16x128xbf16> to vector<16x128xf32>
    %6 = arith.addf %1, %3 : vector<16x128xf32>
    %7 = arith.subf %6, %5 : vector<16x128xf32>
    %cst = arith.constant 9.99999997E-7 : f32
    %8 = vector.broadcast %cst : f32 to vector<16x128xf32>
    %9 = arith.addf %7, %8 : vector<16x128xf32>
    %10 = arith.mulf %9, %9 : vector<16x128xf32>
    %cst_5 = arith.constant dense<0.000000e+00> : vector<16xf32>
    %11 = vector.multi_reduction <add>, %10, %cst_5 [1] : vector<16x128xf32> to vector<16xf32>
    %12 = vector.shape_cast %11 : vector<16xf32> to vector<16x1xf32>
    %13 = math.sqrt %12 : vector<16x1xf32>
    %c0_6 = arith.constant 0 : index
    %c0_7 = arith.constant 0 : index
    %c0_8 = arith.constant 0 : index
    %14 = vector.load %arg4[%c0_6, %c0_7, %c0_8] : memref<3x16x128xbf16, #tpu.memory_space<vmem>>, vector<3x16x128xbf16>
    %15 = arith.extf %14 : vector<3x16x128xbf16> to vector<3x16x128xf32>
    %c0_9 = arith.constant 0 : index
    %c0_10 = arith.constant 0 : index
    %c0_11 = arith.constant 0 : index
    %16 = vector.load %arg5[%c0_9, %c0_10, %c0_11] : memref<3x16x128xbf16, #tpu.memory_space<vmem>>, vector<3x16x128xbf16>
    %17 = arith.extf %16 : vector<3x16x128xbf16> to vector<3x16x128xf32>
    %18 = vector.shape_cast %3 : vector<16x128xf32> to vector<1x16x128xf32>
    %19 = vector.broadcast %18 : vector<1x16x128xf32> to vector<3x16x128xf32>
    %20 = arith.addf %15, %19 : vector<3x16x128xf32>
    %21 = arith.subf %20, %17 : vector<3x16x128xf32>
    %cst_12 = arith.constant 9.99999997E-7 : f32
    %22 = vector.broadcast %cst_12 : f32 to vector<3x16x128xf32>
    %23 = arith.addf %21, %22 : vector<3x16x128xf32>
    %24 = arith.mulf %23, %23 : vector<3x16x128xf32>
    %cst_13 = arith.constant dense<0.000000e+00> : vector<3x16xf32>
    %25 = vector.multi_reduction <add>, %24, %cst_13 [2] : vector<3x16x128xf32> to vector<3x16xf32>
    %26 = vector.shape_cast %25 : vector<3x16xf32> to vector<3x16x1xf32>
    %27 = math.sqrt %26 : vector<3x16x1xf32>
    %cst_14 = arith.constant dense<0.000000e+00> : vector<16x1xf32>
    %28 = vector.multi_reduction <add>, %27, %cst_14 [0] : vector<3x16x1xf32> to vector<16x1xf32>
    %cst_15 = arith.constant 0.333333343 : f32
    %29 = vector.broadcast %cst_15 : f32 to vector<16x1xf32>
    %30 = arith.mulf %28, %29 : vector<16x1xf32>
    %31 = arith.subf %13, %30 : vector<16x1xf32>
    %cst_16 = arith.constant 1.000000e+00 : f32
    %32 = vector.broadcast %cst_16 : f32 to vector<16x1xf32>
    %33 = arith.addf %31, %32 : vector<16x1xf32>
    %cst_17 = arith.constant 0.000000e+00 : f32
    %34 = vector.broadcast %cst_17 : f32 to vector<16x1xf32>
    %35 = arith.maximumf %33, %34 : vector<16x1xf32>
    %36 = tpu.iota {dimensions = array<i32: 0>} : vector<16x1xi32>
    %c16_i32 = arith.constant 16 : i32
    %37 = arith.muli %arg0, %c16_i32 : i32
    %38 = vector.broadcast %37 : i32 to vector<16x1xi32>
    %39 = arith.addi %36, %38 : vector<16x1xi32>
    %c8_i32 = arith.constant 8 : i32
    %40 = vector.broadcast %c8_i32 : i32 to vector<16x1xi32>
    %41 = arith.cmpi slt, %39, %40 : vector<16x1xi32>
    %cst_18 = arith.constant 0.000000e+00 : f32
    %42 = vector.broadcast %cst_18 : f32 to vector<16x1xf32>
    %43 = arith.select %41, %35, %42 : vector<16x1xi1>, vector<16x1xf32>
    %44 = vector.shape_cast %43 : vector<16x1xf32> to vector<1x16x1xf32>
    %cst_19 = arith.constant dense<0.000000e+00> : vector<1xf32>
    %45 = vector.multi_reduction <add>, %44, %cst_19 [1, 2] : vector<1x16x1xf32> to vector<1xf32>
    %46 = vector.shape_cast %45 : vector<1xf32> to vector<1x1x1xf32>
    %47 = vector.extract %46[0, 0, 0] : f32 from vector<1x1x1xf32>
    %48 = vector.broadcast %47 : f32 to vector<1x1x1xf32>
    %c0_20 = arith.constant 0 : index
    %c0_21 = arith.constant 0 : index
    %c0_22 = arith.constant 0 : index
    %49 = vector.load %arg6[%c0_20, %c0_21, %c0_22] : memref<1x1x1xf32, #tpu.memory_space<vmem>>, vector<1x1x1xf32>
    tpu.vector_store %arg6[%c0_20, %c0_21, %c0_22], %48 {strides = array<i32>} : memref<1x1x1xf32, #tpu.memory_space<vmem>>, vector<1x1x1xf32>,
    return
  }
  func.func @transform_0(%arg0: i32) -> (i32, i32) {
    %c0_i32 = arith.constant 0 : i32
    %c0_i32_0 = arith.constant 0 : i32
    return %arg0, %c0_i32 : i32, i32
  }
  func.func @transform_1(%arg0: i32) -> (i32, i32) {
    %c0_i32 = arith.constant 0 : i32
    %c0_i32_0 = arith.constant 0 : i32
    return %arg0, %c0_i32 : i32, i32
  }
  func.func @transform_2(%arg0: i32) -> (i32, i32) {
    %c0_i32 = arith.constant 0 : i32
    %c0_i32_0 = arith.constant 0 : i32
    return %arg0, %c0_i32 : i32, i32
  }
  func.func @transform_3(%arg0: i32) -> (i32, i32, i32) {
    %c0_i32 = arith.constant 0 : i32
    %c0_i32_0 = arith.constant 0 : i32
    %c0_i32_1 = arith.constant 0 : i32
    return %c0_i32, %arg0, %c0_i32_0 : i32, i32, i32
  }
  func.func @transform_4(%arg0: i32) -> (i32, i32, i32) {
    %c0_i32 = arith.constant 0 : i32
    %c0_i32_0 = arith.constant 0 : i32
    %c0_i32_1 = arith.constant 0 : i32
    return %c0_i32, %arg0, %c0_i32_0 : i32, i32, i32
  }
  func.func @transform_5(%arg0: i32) -> (i32, i32, i32) {
    %c0_i32 = arith.constant 0 : i32
    %c0_i32_0 = arith.constant 0 : i32
    %c0_i32_1 = arith.constant 0 : i32
    return %arg0, %c0_i32, %c0_i32_0 : i32, i32, i32
  }
}

</mosaic_0001>

<bundles_post_ra>
// kernel: tpu_custom_call.1
= control target key start
LH: loop header
LB: loop body
LE: loop exit
PB: predicated region body
PF: predicated region fallthrough
CT: control target
= control target key end

     0   :  { %10 = vsyncpa [#allocation3], 0  ;;  %s622_s0 = inlined_call_operand.hbm [shape: bf16[16,128], index: 0, kind: input, shape index: {}]   ;;  %s623_s1 = inlined_call_operand.hbm [shape: bf16[16,128], index: 1, kind: input, shape index: {}]   ;;  %s624_s2 = inlined_call_operand.hbm [shape: bf16[16,128], index: 2, kind: input, shape index: {}]   ;;  %s625_s3 = inlined_call_operand.hbm [shape: bf16[3,16,128], index: 3, kind: input, shape index: {}]   ;;  %s626_s4 = inlined_call_operand.hbm [shape: bf16[3,16,128], index: 4, kind: input, shape index: {}]   ;;  %s627_s5 = inlined_call_operand.hbm [shape: f32[1,1,1], index: 5, kind: output, shape index: {}]  }
   0x1   :  { %11 = vsyncpa [#allocation6], 0 }
   0x2   :  { %12 = vsyncpa [#allocation9], 0 }
   0x3   :  { %13 = vsyncpa [#allocation4], 0  ;;  %s483_s18 = smov [#allocation5]   ;;  %s484_s20 = smov [#allocation8]  }
   0x4   :  { %s31_s19 = sshll.u32 %s483_s18, 4  ;;  %s55_s21 = sshll.u32 %s484_s20, 4  ;;  %s32_s19 = int_to_ptr.vmem [resolvable:$true] %s31_s19  ;;  %s521_s21 = int_to_ptr.vmem [resolvable:$true] %s55_s21 }
   0x5   :  { %s343_s24 = scalar_lea.hbm %s623_s1, 128 }
   0x6   :  { %p344_p0 = scmp.ne.s32.totalorder %s623_s1, %s343_s24  ;;  %p347_p1 = scmp.lt.u32.totalorder %s343_s24, %s623_s1 }
   0x8   :  { %p349_p2 = pnand %p347_p1, %p344_p0 }
   0xa   :  { %352 = shalt.err (!%p349_p2)
}
   0xb   :  { %s353_s29 = scalar_lea.vmem %s32_s19, 128  ;;  %p358_p4 = scmp.lt.s32.totalorder %s32_s19, %s32_s19 }
   0xc   :  { %p354_p3 = scmp.ne.s32.totalorder %s32_s19, %s353_s29  ;;  %p359_p5 = scmp.lt.s32.totalorder %s353_s29, %s353_s29 }
   0xe   :  { %p360_p6 = por %p359_p5, %p358_p4 }
  0x10   :  { %p361_p7 = pnand %p360_p6, %p354_p3 }
  0x12   :  { %364 = shalt.err (!%p361_p7)
}
  0x13   :  { %s485_s30 = smov 64   ;;  %s486_s6 = smov 4  }
  0x14   :  { %37 = dma.hbm_to_vmem [thread:$0]  %s623_s1, 128, %s32_s19, [#allocation6], %s485_s30, %s485_s30, %s486_s6  }
  0x15   :  { %s365_s11 = scalar_lea.hbm %s625_s3, 384 }
  0x16   :  { %p366_p8 = scmp.ne.s32.totalorder %s625_s3, %s365_s11  ;;  %p369_p9 = scmp.lt.u32.totalorder %s365_s11, %s625_s3 }
  0x18   :  { %p371_p10 = pnand %p369_p9, %p366_p8 }
  0x1a   :  { %374 = shalt.err (!%p371_p10)
}
  0x1b   :  { %s375_s16 = scalar_lea.vmem %s521_s21, 384  ;;  %p380_p12 = scmp.lt.s32.totalorder %s521_s21, %s521_s21 }
  0x1c   :  { %p376_p11 = scmp.ne.s32.totalorder %s521_s21, %s375_s16  ;;  %p381_p13 = scmp.lt.s32.totalorder %s375_s16, %s375_s16 }
  0x1e   :  { %p382_p0 = por %p381_p13, %p380_p12 }
  0x20   :  { %p383_p1 = pnand %p382_p0, %p376_p11 }
  0x22   :  { %386 = shalt.err (!%p383_p1)
}
  0x23   :  { %61 = dma.hbm_to_vmem [thread:$0]  %s625_s3, 384, %s521_s21, [#allocation9], %s485_s30, %s485_s30, %s486_s6  }
  0x24   :  { %s487_s18 = smov [#allocation2]   ;;  %s488_s20 = smov [#allocation7]  }
  0x25   :  { %s19_s19 = sshll.u32 %s487_s18, 4  ;;  %s43_s22 = sshll.u32 %s488_s20, 4  ;;  %s20_s19 = int_to_ptr.vmem [resolvable:$true] %s19_s19  ;;  %s558_s22 = int_to_ptr.vmem [resolvable:$true] %s43_s22 }
  0x26   :  { %s387_s25 = scalar_lea.hbm %s622_s0, 128 }
  0x27   :  { %p388_p2 = scmp.ne.s32.totalorder %s622_s0, %s387_s25  ;;  %p391_p3 = scmp.lt.u32.totalorder %s387_s25, %s622_s0 }
  0x29   :  { %p393_p4 = pnand %p391_p3, %p388_p2 }
  0x2b   :  { %396 = shalt.err (!%p393_p4)
}
  0x2c   :  { %s397_s3 = scalar_lea.vmem %s20_s19, 128  ;;  %p402_p6 = scmp.lt.s32.totalorder %s20_s19, %s20_s19 }
  0x2d   :  { %p398_p5 = scmp.ne.s32.totalorder %s20_s19, %s397_s3  ;;  %p403_p7 = scmp.lt.s32.totalorder %s397_s3, %s397_s3 }
  0x2f   :  { %p404_p8 = por %p403_p7, %p402_p6 }
  0x31   :  { %p405_p9 = pnand %p404_p8, %p398_p5 }
  0x33   :  { %408 = shalt.err (!%p405_p9)
}
  0x34   :  { %25 = dma.hbm_to_vmem [thread:$0]  %s622_s0, 128, %s20_s19, [#allocation3], %s485_s30, %s485_s30, %s486_s6  }
  0x35   :  { %s409_s10 = scalar_lea.hbm %s624_s2, 128 }
  0x36   :  { %p410_p10 = scmp.ne.s32.totalorder %s624_s2, %s409_s10  ;;  %p413_p11 = scmp.lt.u32.totalorder %s409_s10, %s624_s2 }
  0x38   :  { %p415_p12 = pnand %p413_p11, %p410_p10 }
  0x3a   :  { %418 = shalt.err (!%p415_p12)
}
  0x3b   :  { %s419_s15 = scalar_lea.vmem %s558_s22, 128  ;;  %p424_p0 = scmp.lt.s32.totalorder %s558_s22, %s558_s22 }
  0x3c   :  { %p420_p13 = scmp.ne.s32.totalorder %s558_s22, %s419_s15  ;;  %p425_p1 = scmp.lt.s32.totalorder %s419_s15, %s419_s15 }
  0x3e   :  { %p426_p2 = por %p425_p1, %p424_p0 }
  0x40   :  { %p427_p3 = pnand %p426_p2, %p420_p13 }
  0x42   :  { %430 = shalt.err (!%p427_p3)
}
  0x43   :  { %49 = dma.hbm_to_vmem [thread:$0]  %s624_s2, 128, %s558_s22, [#allocation6], %s485_s30, %s485_s30, %s486_s6  }
  0x44   :  { %s489_s1 = smov [#allocation10]   ;;  %s431_s20 = scalar_lea.hbm %s626_s4, 384 }
  0x45   :  { %s67_s17 = sshll.u32 %s489_s1, 4  ;;  %p432_p4 = scmp.ne.s32.totalorder %s626_s4, %s431_s20  ;;  %s68_s17 = int_to_ptr.vmem [resolvable:$true] %s67_s17 }
  0x46   :  { %p435_p5 = scmp.lt.u32.totalorder %s431_s20, %s626_s4 }
  0x48   :  { %p437_p6 = pnand %p435_p5, %p432_p4 }
  0x4a   :  { %440 = shalt.err (!%p437_p6)
}
  0x4b   :  { %s441_s27 = scalar_lea.vmem %s68_s17, 384  ;;  %p446_p8 = scmp.lt.s32.totalorder %s68_s17, %s68_s17 }
  0x4c   :  { %p442_p7 = scmp.ne.s32.totalorder %s68_s17, %s441_s27  ;;  %p447_p9 = scmp.lt.s32.totalorder %s441_s27, %s441_s27 }
  0x4e   :  { %p448_p10 = por %p447_p9, %p446_p8 }
  0x50   :  { %p449_p11 = pnand %p448_p10, %p442_p7 }
  0x52   :  { %452 = shalt.err (!%p449_p11)
}
  0x53   :  { %73 = dma.hbm_to_vmem [thread:$0]  %s626_s4, 384, %s68_s17, [#allocation9], %s485_s30, %s485_s30, %s486_s6  }
  0x54   :  { %475 = dma.done.wait [#allocation3], 128  }
  0x55   :  { %476 = vsyncadd [#allocation3], 4294967168 }
  0x56   :  { %477 = dma.done.wait [#allocation6], 256  }
  0x57   :  { %478 = vsyncadd [#allocation6], 4294967040 }
  0x58   :  { %479 = dma.done.wait [#allocation9], 768  }
  0x59   :  { %480 = vsyncadd [#allocation9], 4294966528  ;;  %v290_v0 = vld [vmem:[#allocation5] sm:$0xf]   ;;  %v324_v2 = vld [vmem:[#allocation10] ss:$16 sps:$4 sm:$0xff]  }
  0x5a   :  { %v322_v1 = vld [vmem:[#allocation8] ss:$16 sps:$4 sm:$0xff]   ;;  %v291_v3 = vunpack.c.l.bf16 %v290_v0  ;;  %v319_v5 = vunpack.c.h.bf16 %v324_v2  ;;  %v321_v7 = vld [vmem:[#allocation8 + $0x8] sm:$0xf]   ;;  %v311_v10 = vunpack.c.l.bf16 %v324_v2  ;;  %v294_v14 = vld [vmem:[#allocation7] sm:$0xf]  }
  0x5b   :  { %v307_v4 = vunpack.c.h.bf16 %v322_v1  ;;  %v299_v6 = vunpack.c.l.bf16 %v322_v1  ;;  %v323_v8 = vld [vmem:[#allocation10 + $0x8] sm:$0xf]   ;;  %v286_v9 = vld [vmem:[#allocation2] sm:$0xf]   ;;  %v303_v11 = vunpack.c.l.bf16 %v321_v7  ;;  %v295_v17 = vunpack.c.l.bf16 %v294_v14  ;;  %s490_s4 = smov [#allocation11]  }
  0x5c   :  { %v315_v12 = vunpack.c.l.bf16 %v323_v8  ;;  %v287_v13 = vunpack.c.l.bf16 %v286_v9  ;;  %vm252_vm8 = vcmask 7168   ;;  %s274_s30 = sshll.u32 %s490_s4, 4  ;;  %vm266_vm9 = vcmask 0   ;;  %s275_s30 = int_to_ptr.vmem [resolvable:$true] %s274_s30 }
  0x5d   :  { %v155_v15 = vadd.f32 %v307_v4, %v291_v3  ;;  %v151_v16 = vadd.f32 %v299_v6, %v291_v3  ;;  %v153_v18 = vadd.f32 %v303_v11, %v291_v3  ;;  %s453_s28 = scalar_lea.vmem %s275_s30, 16  ;;  %s457_s29 = scalar_lea.vmem %s275_s30, 32 }
  0x5e   :  { %v101_v19 = vadd.f32 %v291_v3, %v287_v13  ;;  %p454_p12 = scmp.ne.s32.totalorder %s275_s30, %s453_s28  ;;  %p458_p13 = scmp.lt.s32.totalorder %s275_s30, %s275_s30 }
  0x5f   :  { %v161_v20 = vsub.f32 %v155_v15, %v319_v5  ;;  %v157_v21 = vsub.f32 %v151_v16, %v311_v10  ;;  %v159_v22 = vsub.f32 %v153_v18, %v315_v12  ;;  %p459_p0 = scmp.lt.s32.totalorder %s457_s29, %s453_s28 }
  0x60   :  { %v103_v23 = vsub.f32 %v101_v19, %v295_v17 }
  0x61   :  { %v167_v24 = vadd.f32 1e-06, %v161_v20  ;;  %v163_v25 = vadd.f32 1e-06, %v157_v21  ;;  %v165_v26 = vadd.f32 1e-06, %v159_v22  ;;  %p460_p1 = por %p459_p0, %p458_p13 }
  0x62   :  { %v105_v27 = vadd.f32 1e-06, %v103_v23 }
  0x63   :  { %v173_v28 = vmul.f32 %v167_v24, %v167_v24  ;;  %v169_v29 = vmul.f32 %v163_v25, %v163_v25  ;;  %v171_v30 = vmul.f32 %v165_v26, %v165_v26  ;;  %p461_p2 = pnand %p460_p1, %p454_p12 }
  0x64   :  { %v107_v31 = vmul.f32 %v105_v27, %v105_v27 }
  0x65   :  { %183 = vadd.xlane.f32.xlu1 %v173_v28  ;;  %175 = vadd.xlane.f32.xlu0 %v169_v29 }
  0x69   :  { %179 = vadd.xlane.f32.xlu0 %v171_v30  ;;  %109 = vadd.xlane.f32.xlu1 %v107_v31 }
  0xf2   :  { %v184_v32 = vpop.xlane.xlu1 %183  ;;  %v176_v33 = vpop.xlane.xlu0 %175 }
  0xf3   :  { %335 = vrsqrt.f32 %v184_v32  ;;  %vm189_vm0 = vcmp.eq.f32.partialorder %v176_v33, inf  ;;  %v192_v42 = vand.u32 2147483648, %v176_v33  ;;  %vm191_vm2 = vcmp.eq.f32.partialorder %v176_v33, 0.0 }
  0xf4   :  { %337 = vrsqrt.f32 %v176_v33  ;;  %vm217_vm3 = vcmp.eq.f32.partialorder %v184_v32, inf  ;;  %v220_v51 = vand.u32 2147483648, %v184_v32  ;;  %vm219_vm5 = vcmp.eq.f32.partialorder %v184_v32, 0.0 }
  0xf6   :  { %v180_v34 = vpop.xlane.xlu0 %179  ;;  %v110_v35 = vpop.xlane.xlu1 %109 }
  0xf7   :  { %339 = vrsqrt.f32 %v180_v34  ;;  %vm203_vm1 = vcmp.eq.f32.partialorder %v180_v34, inf  ;;  %v206_v45 = vand.u32 2147483648, %v180_v34  ;;  %vm205_vm4 = vcmp.eq.f32.partialorder %v180_v34, 0.0 }
  0xf8   :  { %341 = vrsqrt.f32 %v110_v35  ;;  %vm115_vm6 = vcmp.eq.f32.partialorder %v110_v35, inf  ;;  %v118_v56 = vand.u32 2147483648, %v110_v35  ;;  %vm117_vm7 = vcmp.eq.f32.partialorder %v110_v35, 0.0 }
  0xfd   :  { %v336_v36 = vpop.eup %335 }
  0xfe   :  { %v338_v37 = vpop.eup %337  ;;  %v216_v39 = vmul.f32 %v336_v36, %v184_v32 }
  0xff   :  { %v188_v38 = vmul.f32 %v338_v37, %v176_v33 }
 0x100   :  { %v218_v48 = vsel %vm217_vm3, %v184_v32, %v216_v39 }
 0x101   :  { %v340_v40 = vpop.eup %339  ;;  %v190_v44 = vsel %vm189_vm0, %v176_v33, %v188_v38  ;;  %v221_v53 = vsel %vm219_vm5, %v220_v51, %v218_v48 }
 0x102   :  { %v342_v41 = vpop.eup %341  ;;  %v202_v43 = vmul.f32 %v340_v40, %v180_v34  ;;  %v193_v49 = vsel %vm191_vm2, %v192_v42, %v190_v44 }
 0x103   :  { %v114_v46 = vmul.f32 %v342_v41, %v110_v35 }
 0x104   :  { %v204_v47 = vsel %vm203_vm1, %v180_v34, %v202_v43 }
 0x105   :  { %v207_v50 = vsel %vm205_vm4, %v206_v45, %v204_v47  ;;  %v116_v54 = vsel %vm115_vm6, %v110_v35, %v114_v46 }
 0x106   :  { %v229_v52 = vadd.f32 %v207_v50, %v193_v49  ;;  %v119_v58 = vsel %vm117_vm7, %v118_v56, %v116_v54 }
 0x108   :  { %v230_v55 = vadd.f32 %v229_v52, %v221_v53 }
 0x10a   :  { %v233_v57 = vmul.f32 0.33333334, %v230_v55 }
 0x10c   :  { %v235_v59 = vsub.f32 %v119_v58, %v233_v57 }
 0x10e   :  { %v237_v60 = vadd.f32 1.0, %v235_v59 }
 0x110   :  { %v239_v61 = vmax.f32 %v237_v60, 0.0 }
 0x112   :  { %v253_v62 = vsel %vm252_vm8, %v239_v61, 0.0 }
 0x113   :  { %256 = vadd.xlane.f32.xlu0 %v253_v62 }
 0x1a0   :  { %v257_v63 = vpop.xlane.xlu0 %256 }
 0x1a1   :  { %v258_v0 = vrot.slane %v257_v63, 4 }
 0x1a3   :  { %v259_v1 = vadd.f32 %v258_v0, %v257_v63 }
 0x1a5   :  { %v260_v2 = vrot.slane %v259_v1, 2 }
 0x1a7   :  { %v261_v3 = vadd.f32 %v260_v2, %v259_v1 }
 0x1a9   :  { %v262_v4 = vrot.slane %v261_v3, 1 }
 0x1ab   :  { %v263_v5 = vadd.f32 %v262_v4, %v261_v3 }
 0x1ad   :  { %325 = vpush %v263_v5 }
 0x1de   :  { %s326_s6 = spop %325 }
 0x1df   :  { %v265_v6 = vstv %s326_s6 }
 0x1e0   :  { %267 = vst.msk [vmem:[#allocation11] sm:$0x1] %vm266_vm9, %v265_v6 }
 0x1e1   :  { %464 = shalt.err (!%p461_p2)
}
 0x1e2   :  { %s465_s7 = scalar_lea.hbm %s627_s5, 16 }
 0x1e3   :  { %p466_p3 = scmp.ne.s32.totalorder %s627_s5, %s465_s7  ;;  %p469_p4 = scmp.lt.u32.totalorder %s465_s7, %s627_s5 }
 0x1e5   :  { %p471_p5 = pnand %p469_p4, %p466_p3 }
 0x1e7   :  { %474 = shalt.err (!%p471_p5)
}
 0x1e8   :  { %277 = dma.vmem_to_hbm [thread:$0]  %s275_s30, 16, %s627_s5, [#allocation4]  }
 0x1e9   :  { %481 = dma.done.wait [#allocation4], 16  }
 0x1ea   :  { %482 = vsyncadd [#allocation4], 4294967280 }
 0x1eb   :  { %281 = vsyncpa [#allocation3], 1 }
 0x1ec   :  { %282 = vsyncpa [#allocation6], 1 }
 0x1ed   :  { %283 = vsyncpa [#allocation9], 1 }
 0x1ee   :  { %284 = vsyncpa [#allocation4], 1 }

</bundles_post_ra>
